<compile_context>
chip_gen: v5e
topology: v5e:2x2
jax: 0.10.0
libtpu: 0.0.40
codegen_flags: <defaults>
</compile_context>

<pallas_src>
import functools

import jax
import jax.numpy as jnp
from jax.experimental import pallas as pl
from jax.experimental.pallas import tpu as pltpu


IN_DIM = 784      # 28*28
H_DIM = 100       # fc1 out (logical)
H_PAD = 128       # fc1 out (padded, lane-dense)
OUT_DIM = 10      # fc2 out (logical)
OUT_PAD = 16      # fc2 out (padded; narrow f32 output -> 8x smaller writeback)
NEG_BIG = -1e30   # padded-class bias -> exp() == 0 in the softmax


def _round_up(n, m):
    return ((n + m - 1) // m) * m


def nonbinary_net_kernel(slope_ref, x_ref, w1_ref, b1_ref, w2_ref, b2_ref, out_ref):
    # slope_ref: SMEM (1,) f32
    # x_ref   : (TB, 784)  f32   VMEM (one batch tile; bf16 cast happens here,
    #                            not as a separate wrapper-side HBM pass)
    # w1_ref  : (784, 128) bf16  VMEM (resident), b1_ref: (1, 128) f32
    # w2_ref  : (128, 16)  bf16  VMEM (resident), b2_ref: (1, 16)  f32
    #           (rows 100:128 of w2 are exactly 0; cols 10:16 of b2 are -1e30)
    # out_ref : (TB, 16)   f32   VMEM
    a = slope_ref[0] * 0.5  # fuse slope into the hardsigmoid affine

    x = x_ref[...].astype(jnp.bfloat16)
    # fc1 (bf16 MXU, f32 accumulate)
    h = jnp.dot(x, w1_ref[...], preferred_element_type=jnp.float32) + b1_ref[...]
    # slope-scaled Hardsigmoid: clamp((slope*h + 1)/2, 0, 1) == clamp(h*a + 0.5, 0, 1)
    h = jnp.clip(h * a + 0.5, 0.0, 1.0)
    # fc2 (bf16 MXU, f32 accumulate); padded h columns are 0.5 but the matching
    # w2 rows are exactly zero, so they contribute nothing.
    logits = jnp.dot(h.astype(jnp.bfloat16), w2_ref[...],
                     preferred_element_type=jnp.float32) + b2_ref[...]
    # log_softmax over 16 lanes; padded lanes have logit ~ -1e30 so they
    # contribute exp(.) == 0 and do not perturb max / lse.
    m = jnp.max(logits, axis=1, keepdims=True)
    shifted = logits - m
    lse = jnp.log(jnp.sum(jnp.exp(shifted), axis=1, keepdims=True))
    out_ref[...] = shifted - lse


def prepare_params(w1, b1, w2, b2):
    """Pad/cast PyTorch-layout params to the kernel's padded bf16 layout.

    w1: (784, 100), b1: (100,), w2: (100, 10), b2: (10,)   (f32, already
    transposed vs. PyTorch's (out, in) storage).

    NOTE: after the hardsigmoid, padded h columns 100:128 equal 0.5 (not 0),
    so fc2 correctness REQUIRES w2p rows 100:128 to be exactly zero (they are,
    via jnp.zeros below) — keep that invariant if this layout ever changes.
    """
    w1p = jnp.zeros((IN_DIM, H_PAD), jnp.bfloat16).at[:, :H_DIM].set(
        w1.astype(jnp.bfloat16))
    b1p = jnp.zeros((1, H_PAD), jnp.float32).at[0, :H_DIM].set(
        b1.astype(jnp.float32))
    w2p = jnp.zeros((H_PAD, OUT_PAD), jnp.bfloat16).at[:H_DIM, :OUT_DIM].set(
        w2.astype(jnp.bfloat16))
    b2p = jnp.full((1, OUT_PAD), NEG_BIG, jnp.float32).at[0, :OUT_DIM].set(
        b2.astype(jnp.float32))
    return w1p, b1p, w2p, b2p


def _choose_tb(batch, target):
    """Batch-tile size: full-array block for tiny batches; otherwise a
    multiple of 16 capped near ceil(B/2) so small/medium batches still give
    the 'parallel' grid axis >= 2 steps (both v7x TensorCores busy)."""
    if batch <= 16:
        return batch                      # block == full array dim: always legal
    target = max(16, (target // 16) * 16)
    if batch <= 2 * target:
        return max(16, _round_up(pl.cdiv(batch, 2), 16))
    return target


@functools.partial(jax.jit, static_argnames=("tb",))
def nonbinary_net_forward(x, slope, w1p, b1p, w2p, b2p, *, tb=2048):
    """x: (B, 1, 28, 28) or (B, 784) f32; slope: python/0-d float.

    Params must already be padded via prepare_params(). Returns (B, 10) f32
    log-probabilities.
    """
    x2d = jnp.reshape(x, (-1, IN_DIM)).astype(jnp.float32)
    B = x2d.shape[0]

    TB = _choose_tb(B, tb)
    grid = (pl.cdiv(B, TB),)              # ragged last block handled by Pallas
    slope_arr = jnp.asarray([slope], dtype=jnp.float32)

    cost = pl.CostEstimate(
        flops=2 * B * IN_DIM * H_PAD + 2 * B * H_PAD * OUT_PAD,
        transcendentals=B * OUT_PAD,
        bytes_accessed=(B * IN_DIM * 4            # x (f32, cast in-kernel)
                        + IN_DIM * H_PAD * 2      # w1 (bf16)
                        + H_PAD * OUT_PAD * 2     # w2 (bf16)
                        + B * OUT_PAD * 4),       # out (narrow f32)
    )

    out = pl.pallas_call(
        nonbinary_net_kernel,
        out_shape=jax.ShapeDtypeStruct((B, OUT_PAD), jnp.float32),
        grid=grid,
        in_specs=[
            pl.BlockSpec(memory_space=pltpu.MemorySpace.SMEM),        # slope
            pl.BlockSpec((TB, IN_DIM), lambda i: (i, 0)),             # x tile
            pl.BlockSpec((IN_DIM, H_PAD), lambda i: (0, 0)),          # w1 (resident)
            pl.BlockSpec((1, H_PAD), lambda i: (0, 0)),               # b1
            pl.BlockSpec((H_PAD, OUT_PAD), lambda i: (0, 0)),         # w2 (resident)
            pl.BlockSpec((1, OUT_PAD), lambda i: (0, 0)),             # b2
        ],
        out_specs=pl.BlockSpec((TB, OUT_PAD), lambda i: (i, 0)),
        compiler_params=pltpu.CompilerParams(
            dimension_semantics=("parallel",),
            vmem_limit_bytes=32 * 1024 * 1024),   # f32 x tiles @ TB=2048 ~13 MiB dbl-buffered
        cost_estimate=cost,
    )(slope_arr, x2d, w1p, b1p, w2p, b2p)

    return out[:, :OUT_DIM]


def init_params(key):
    """Deterministic init matching nn.Linear's U(-1/sqrt(fan_in), 1/sqrt(fan_in)).

    Returned in (in_features, out_features) layout (transposed vs. PyTorch).
    """
    k1, k2, k3, k4 = jax.random.split(key, 4)
    bound1 = 1.0 / jnp.sqrt(784.0)
    bound2 = 1.0 / jnp.sqrt(100.0)
    w1 = jax.random.uniform(k1, (IN_DIM, H_DIM), jnp.float32, -bound1, bound1)
    b1 = jax.random.uniform(k2, (H_DIM,), jnp.float32, -bound1, bound1)
    w2 = jax.random.uniform(k3, (H_DIM, OUT_DIM), jnp.float32, -bound2, bound2)
    b2 = jax.random.uniform(k4, (OUT_DIM,), jnp.float32, -bound2, bound2)
    return w1, b1, w2, b2


def reference_forward(x, slope, w1, b1, w2, b2):
    """Pure-JAX f32 reference of the PyTorch forward."""
    x2d = jnp.reshape(x, (-1, IN_DIM)).astype(jnp.float32)
    h = jnp.clip((slope * (x2d @ w1 + b1) + 1.0) * 0.5, 0.0, 1.0)
    logits = h @ w2 + b2
    return jax.nn.log_softmax(logits, axis=1)


if __name__ == "__main__":
    key = jax.random.PRNGKey(0)
    k_params, k_x1, k_x2 = jax.random.split(key, 3)
    w1, b1, w2, b2 = init_params(k_params)
    w1p, b1p, w2p, b2p = prepare_params(w1, b1, w2, b2)
    slope = 1.0

    # small MNIST-like batch: (B=2, C=1, H=28, W=28) -> flattened to (2, 784)
    x = jax.random.normal(k_x1, (2, 1, 28, 28), dtype=jnp.float32)
    out = jax.block_until_ready(nonbinary_net_forward(x, slope, w1p, b1p, w2p, b2p))
    assert out.shape == (2, 10)
    # sanity: log_softmax rows should sum (in prob space) to ~1
    row_sums = jnp.sum(jnp.exp(out), axis=1)
    assert bool(jnp.all(jnp.abs(row_sums - 1.0) < 1e-3)), row_sums
    # correctness vs. pure-JAX f32 reference (loose tol for bf16 matmul inputs)
    ref = reference_forward(x, slope, w1, b1, w2, b2)
    assert bool(jnp.max(jnp.abs(out - ref)) < 5e-2), jnp.max(jnp.abs(out - ref))

    # ragged batch: exercises the multi-step grid and the masked partial last block
    xb = jax.random.normal(k_x2, (40, 1, 28, 28), dtype=jnp.float32)
    outb = jax.block_until_ready(nonbinary_net_forward(xb, slope, w1p, b1p, w2p, b2p))
    refb = reference_forward(xb, slope, w1, b1, w2, b2)
    assert outb.shape == (40, 10)
    assert bool(jnp.max(jnp.abs(outb - refb)) < 5e-2), jnp.max(jnp.abs(outb - refb))

    print("KERNEL_OK")
</pallas_src>

<mosaic_0001>
module attributes {stable_mosaic.version = 11 : i64} {
  func.func @nonbinary_net_kernel(%arg0: i32, %arg1: memref<1xf32, #tpu.memory_space<smem>>, %arg2: memref<2x784xf32, #tpu.memory_space<vmem>>, %arg3: memref<784x128xbf16, #tpu.memory_space<vmem>>, %arg4: memref<1x128xf32, #tpu.memory_space<vmem>>, %arg5: memref<128x16xbf16, #tpu.memory_space<vmem>>, %arg6: memref<1x16xf32, #tpu.memory_space<vmem>>, %arg7: memref<2x16xf32, #tpu.memory_space<vmem>>) attributes {dimension_semantics = [#tpu.dimension_semantics<parallel>], iteration_bounds = array<i64: 1>, scalar_prefetch = 0 : i64, scratch_operands = 0 : i64, tpu.core_type = #tpu.core_type<tc>, window_params = [{transform_indices = @transform_0, window_bounds = array<i64: 1>}, {transform_indices = @transform_1, window_bounds = array<i64: 2, 784>}, {pipeline_mode = #tpu.pipeline_mode<synchronous>, transform_indices = @transform_2, window_bounds = array<i64: 784, 128>}, {pipeline_mode = #tpu.pipeline_mode<synchronous>, transform_indices = @transform_3, window_bounds = array<i64: 1, 128>}, {pipeline_mode = #tpu.pipeline_mode<synchronous>, transform_indices = @transform_4, window_bounds = array<i64: 128, 16>}, {pipeline_mode = #tpu.pipeline_mode<synchronous>, transform_indices = @transform_5, window_bounds = array<i64: 1, 16>}, {transform_indices = @transform_6, window_bounds = array<i64: 2, 16>}]} {
    %c0 = arith.constant 0 : index
    %0 = memref.load %arg1[%c0] : memref<1xf32, #tpu.memory_space<smem>>
    %cst = arith.constant 5.000000e-01 : f32
    %1 = arith.mulf %0, %cst : f32
    %c0_0 = arith.constant 0 : index
    %c0_1 = arith.constant 0 : index
    %2 = vector.load %arg2[%c0_0, %c0_1] : memref<2x784xf32, #tpu.memory_space<vmem>>, vector<2x784xf32>
    %3 = arith.truncf %2 : vector<2x784xf32> to vector<2x784xbf16>
    %c0_2 = arith.constant 0 : index
    %c0_3 = arith.constant 0 : index
    %4 = vector.load %arg3[%c0_2, %c0_3] : memref<784x128xbf16, #tpu.memory_space<vmem>>, vector<784x128xbf16>
    %cst_4 = arith.constant dense<0.000000e+00> : vector<2x128xf32>
    %5 = tpu.matmul %3, %4, %cst_4 {dimension_numbers = #tpu.dot_dimension_numbers<[1], [0], [0], [1], [0, 0, 1, 1], [], []>} : vector<2x784xbf16>, vector<784x128xbf16>, vector<2x128xf32> -> vector<2x128xf32>
    %c0_5 = arith.constant 0 : index
    %c0_6 = arith.constant 0 : index
    %6 = vector.load %arg4[%c0_5, %c0_6] : memref<1x128xf32, #tpu.memory_space<vmem>>, vector<1x128xf32>
    %7 = vector.broadcast %6 : vector<1x128xf32> to vector<2x128xf32>
    %8 = arith.addf %5, %7 : vector<2x128xf32>
    %9 = vector.broadcast %1 : f32 to vector<2x128xf32>
    %10 = arith.mulf %8, %9 : vector<2x128xf32>
    %cst_7 = arith.constant 5.000000e-01 : f32
    %11 = vector.broadcast %cst_7 : f32 to vector<2x128xf32>
    %12 = arith.addf %10, %11 : vector<2x128xf32>
    %cst_8 = arith.constant 0.000000e+00 : f32
    %cst_9 = arith.constant 1.000000e+00 : f32
    %13 = vector.broadcast %cst_8 : f32 to vector<2x128xf32>
    %14 = arith.maximumf %13, %12 : vector<2x128xf32>
    %15 = vector.broadcast %cst_9 : f32 to vector<2x128xf32>
    %16 = arith.minimumf %15, %14 : vector<2x128xf32>
    %17 = arith.truncf %16 : vector<2x128xf32> to vector<2x128xbf16>
    %c0_10 = arith.constant 0 : index
    %c0_11 = arith.constant 0 : index
    %18 = vector.load %arg5[%c0_10, %c0_11] : memref<128x16xbf16, #tpu.memory_space<vmem>>, vector<128x16xbf16>
    %cst_12 = arith.constant dense<0.000000e+00> : vector<2x16xf32>
    %19 = tpu.matmul %17, %18, %cst_12 {dimension_numbers = #tpu.dot_dimension_numbers<[1], [0], [0], [1], [0, 0, 1, 1], [], []>} : vector<2x128xbf16>, vector<128x16xbf16>, vector<2x16xf32> -> vector<2x16xf32>
    %c0_13 = arith.constant 0 : index
    %c0_14 = arith.constant 0 : index
    %20 = vector.load %arg6[%c0_13, %c0_14] : memref<1x16xf32, #tpu.memory_space<vmem>>, vector<1x16xf32>
    %21 = vector.broadcast %20 : vector<1x16xf32> to vector<2x16xf32>
    %22 = arith.addf %19, %21 : vector<2x16xf32>
    %cst_15 = arith.constant dense<0xFF800000> : vector<2xf32>
    %23 = vector.multi_reduction <maximumf>, %22, %cst_15 [1] : vector<2x16xf32> to vector<2xf32>
    %24 = vector.shape_cast %23 : vector<2xf32> to vector<2x1xf32>
    %25 = vector.broadcast %24 : vector<2x1xf32> to vector<2x16xf32>
    %26 = arith.subf %22, %25 : vector<2x16xf32>
    %27 = math.exp %26 : vector<2x16xf32>
    %cst_16 = arith.constant dense<0.000000e+00> : vector<2xf32>
    %28 = vector.multi_reduction <add>, %27, %cst_16 [1] : vector<2x16xf32> to vector<2xf32>
    %29 = vector.shape_cast %28 : vector<2xf32> to vector<2x1xf32>
    %30 = math.log %29 : vector<2x1xf32>
    %31 = vector.broadcast %30 : vector<2x1xf32> to vector<2x16xf32>
    %32 = arith.subf %26, %31 : vector<2x16xf32>
    %c0_17 = arith.constant 0 : index
    %c0_18 = arith.constant 0 : index
    %33 = vector.load %arg7[%c0_17, %c0_18] : memref<2x16xf32, #tpu.memory_space<vmem>>, vector<2x16xf32>
    tpu.vector_store %arg7[%c0_17, %c0_18], %32 {strides = array<i32>} : memref<2x16xf32, #tpu.memory_space<vmem>>, vector<2x16xf32>,
    return
  }
  func.func @transform_0(%arg0: i32) -> i32 {
    %c0_i32 = arith.constant 0 : i32
    %c0_i32_0 = arith.constant 0 : i32
    return %c0_i32 : i32
  }
  func.func @transform_1(%arg0: i32) -> (i32, i32) {
    %c0_i32 = arith.constant 0 : i32
    %c0_i32_0 = arith.constant 0 : i32
    return %arg0, %c0_i32 : i32, i32
  }
  func.func @transform_2(%arg0: i32) -> (i32, i32) {
    %c0_i32 = arith.constant 0 : i32
    %c0_i32_0 = arith.constant 0 : i32
    %c0_i32_1 = arith.constant 0 : i32
    return %c0_i32, %c0_i32_0 : i32, i32
  }
  func.func @transform_3(%arg0: i32) -> (i32, i32) {
    %c0_i32 = arith.constant 0 : i32
    %c0_i32_0 = arith.constant 0 : i32
    %c0_i32_1 = arith.constant 0 : i32
    return %c0_i32, %c0_i32_0 : i32, i32
  }
  func.func @transform_4(%arg0: i32) -> (i32, i32) {
    %c0_i32 = arith.constant 0 : i32
    %c0_i32_0 = arith.constant 0 : i32
    %c0_i32_1 = arith.constant 0 : i32
    return %c0_i32, %c0_i32_0 : i32, i32
  }
  func.func @transform_5(%arg0: i32) -> (i32, i32) {
    %c0_i32 = arith.constant 0 : i32
    %c0_i32_0 = arith.constant 0 : i32
    %c0_i32_1 = arith.constant 0 : i32
    return %c0_i32, %c0_i32_0 : i32, i32
  }
  func.func @transform_6(%arg0: i32) -> (i32, i32) {
    %c0_i32 = arith.constant 0 : i32
    %c0_i32_0 = arith.constant 0 : i32
    return %arg0, %c0_i32 : i32, i32
  }
}

</mosaic_0001>

<bundles_post_ra>
// kernel: nonbinary_net_forward.1
= control target key start
LH: loop header
LB: loop body
LE: loop exit
PB: predicated region body
PF: predicated region fallthrough
CT: control target
= control target key end

     0   :  { %12 = vsyncpa [#allocation4], 0  ;;  %s1116_s0 = inlined_call_operand.<no memory space> [shape: f32[1], index: 0, kind: input, shape index: {}]   ;;  %s1117_s1 = inlined_call_operand.vmem [shape: f32[2,784], index: 1, kind: input, shape index: {}]   ;;  %s1118_s2 = inlined_call_operand.hbm [shape: bf16[784,128], index: 2, kind: input, shape index: {}]   ;;  %s1119_s3 = inlined_call_operand.vmem [shape: f32[1,128], index: 3, kind: input, shape index: {}]   ;;  %s1120_s4 = inlined_call_operand.vmem [shape: bf16[128,16], index: 4, kind: input, shape index: {}]   ;;  %s1121_s5 = inlined_call_operand.vmem [shape: f32[1,16], index: 5, kind: input, shape index: {}]   ;;  %s1122_s6 = inlined_call_operand.hbm [shape: f32[2,16], index: 6, kind: output, shape index: {}]  }
   0x1   :  { %13 = vsyncpa [#allocation5], 0  ;;  %s22_s23 = sshll.u32 %s1118_s2, 4  ;;  %s1029_s24 = smov [#allocation3]   ;;  %s23_s23 = int_to_ptr.hbm [resolvable:$true] %s22_s23 }
   0x2   :  { %s24_s25 = sshll.u32 %s1029_s24, 4  ;;  %s1030_s26 = smov 64   ;;  %s25_s25 = int_to_ptr.vmem [resolvable:$true] %s24_s25 }
   0x3   :  { %s1031_s27 = smov 4  }
   0x4   :  { %30 = dma.hbm_to_vmem [thread:$0]  %s23_s23, 6272, %s25_s25, [#allocation4], %s1030_s26, %s1030_s26, %s1031_s27  }
   0x5   :  { %1025 = dma.done.wait [#allocation4], 6272  }
   0x6   :  { %1026 = vsyncadd [#allocation4], 4294961024  ;;  %v917_v0 = vld [vmem:[#allocation3 + $0x38] sm:$0xff]  ;;  %v916_v3 = vld [vmem:[#allocation3 + $0x30] sm:$0xff]  ;;  %vm468_vm0 = vcmask 130048   ;;  %vm650_vm1 = vcmask 123904  }
   0x7   :  { %v925_v1 = vld [vmem:[#allocation3 + $0x78] sm:$0xff]  ;;  %472 = vmatpush.bf16.msra.mxu0 %v917_v0  ;;  %v924_v4 = vld [vmem:[#allocation3 + $0x70] sm:$0xff]  ;;  %v915_v8 = vld [vmem:[#allocation3 + $0x28] sm:$0xff]  ;;  %s671_s28 = sshll.u32 %s1122_s6, 4  ;;  %s672_s28 = int_to_ptr.hbm [resolvable:$true] %s671_s28 }
   0x8   :  { %v933_v2 = vld [vmem:[#allocation3 + $0xb8] sm:$0xff]  ;;  %485 = vmatpush.bf16.msra.mxu1 %v925_v1  ;;  %v932_v5 = vld [vmem:[#allocation3 + $0xb0] sm:$0xff]  ;;  %v923_v9 = vld [vmem:[#allocation3 + $0x68] sm:$0xff] }
   0x9   :  { %498 = vmatpush.bf16.msra.mxu2 %v933_v2  ;;  %v941_v6 = vld [vmem:[#allocation3 + $0xf8] sm:$0xff]  ;;  %v940_v7 = vld [vmem:[#allocation3 + $0xf0] sm:$0xff]  ;;  %v931_v10 = vld [vmem:[#allocation3 + $0xa8] sm:$0xff] }
   0xa   :  { %511 = vmatpush.bf16.msra.mxu3 %v941_v6  ;;  %v939_v11 = vld [vmem:[#allocation3 + $0xe8] sm:$0xff]  ;;  %v914_v12 = vld [vmem:[#allocation3 + $0x20] sm:$0xff]  ;;  %v44_v15 = vld [vmem:[%s1117_s1] sm:$0xff] }
   0xb   :  { %473 = vmatpush.bf16.msra.mxu0 %v916_v3  ;;  %v922_v13 = vld [vmem:[#allocation3 + $0x60] sm:$0xff]  ;;  %48 = vst [vmem:[#allocation1] ss:$4 sm:$0xff] %v44_v15  ;;  %v913_v17 = vld [vmem:[#allocation3 + $0x18] sm:$0xff]  ;;  %v912_v22 = vld [vmem:[#allocation3 + $0x10] sm:$0xff] }
   0xc   :  { %486 = vmatpush.bf16.msra.mxu1 %v924_v4  ;;  %v930_v14 = vld [vmem:[#allocation3 + $0xa0] sm:$0xff]  ;;  %v921_v18 = vld [vmem:[#allocation3 + $0x58] sm:$0xff]  ;;  %v920_v23 = vld [vmem:[#allocation3 + $0x50] sm:$0xff] }
   0xd   :  { %499 = vmatpush.bf16.msra.mxu2 %v932_v5  ;;  %v938_v16 = vld [vmem:[#allocation3 + $0xe0] sm:$0xff]  ;;  %v929_v20 = vld [vmem:[#allocation3 + $0x98] sm:$0xff]  ;;  %v928_v24 = vld [vmem:[#allocation3 + $0x90] sm:$0xff] }
   0xe   :  { %512 = vmatpush.bf16.msra.mxu3 %v940_v7  ;;  %v45_v19 = vld [vmem:[%s1117_s1 + $0x8] sm:$0x3f]  ;;  %v937_v21 = vld [vmem:[#allocation3 + $0xd8] sm:$0xff]  ;;  %v936_v25 = vld [vmem:[#allocation3 + $0xd0] sm:$0xff] }
   0xf   :  { %474 = vmatpush.bf16.msra.mxu0 %v915_v8  ;;  %50 = vst [vmem:[#allocation1 + $0x20] ss:$4 sm:$0xff] %v45_v19  ;;  %v911_v26 = vld [vmem:[#allocation3 + $0x8] sm:$0xff]  ;;  %v910_v29 = vld [vmem:[#allocation3] sm:$0xff]  ;;  %v949_v34 = vld [vmem:[#allocation3 + $0x138] sm:$0xff] }
  0x10   :  { %487 = vmatpush.bf16.msra.mxu1 %v923_v9  ;;  %v919_v27 = vld [vmem:[#allocation3 + $0x48] sm:$0xff]  ;;  %v918_v30 = vld [vmem:[#allocation3 + $0x40] sm:$0xff]  ;;  %v957_v35 = vld [vmem:[#allocation3 + $0x178] sm:$0xff] }
  0x11   :  { %500 = vmatpush.bf16.msra.mxu2 %v931_v10  ;;  %v927_v28 = vld [vmem:[#allocation3 + $0x88] sm:$0xff]  ;;  %v926_v36 = vld [vmem:[#allocation3 + $0x80] sm:$0xff]  ;;  %v948_v43 = vld [vmem:[#allocation3 + $0x130] sm:$0xff] }
  0x12   :  { %513 = vmatpush.bf16.msra.mxu3 %v939_v11  ;;  %v935_v31 = vld [vmem:[#allocation3 + $0xc8] sm:$0xff]  ;;  %v51_v32 = vld.sshfl [vmem:[#allocation1] sm:$0xff pattern:$0x73625140]  ;;  %v934_v40 = vld [vmem:[#allocation3 + $0xc0] sm:$0xff] }
  0x13   :  { %475 = vmatpush.bf16.msra.mxu0 %v914_v12  ;;  %v52_v33 = vld.sshfl [vmem:[#allocation1 + $0x8] sm:$0xff pattern:$0x73625140]  ;;  %v53_v37 = vld.sshfl [vmem:[#allocation1 + $0x10] sm:$0xff pattern:$0x73625140]  ;;  %v65_v38 = vpack.c.bf16 %v51_v32, %v51_v32 }
  0x14   :  { %488 = vmatpush.bf16.msra.mxu1 %v922_v13  ;;  %v66_v39 = vpack.c.bf16 %v52_v33, %v52_v33  ;;  %v958_v41 = vld [vmem:[#allocation3 + $0x180] sm:$0xff]  ;;  %v54_v42 = vld.sshfl [vmem:[#allocation1 + $0x18] sm:$0xff pattern:$0x73625140]  ;;  %v67_v45 = vpack.c.bf16 %v53_v37, %v53_v37  ;;  %v947_v47 = vld [vmem:[#allocation3 + $0x128] sm:$0xff] }
  0x15   :  { %501 = vmatpush.bf16.msra.mxu2 %v930_v14  ;;  %v956_v44 = vld [vmem:[#allocation3 + $0x170] sm:$0xff]  ;;  %v68_v46 = vpack.c.bf16 %v54_v42, %v54_v42  ;;  %v955_v48 = vld [vmem:[#allocation3 + $0x168] sm:$0xff]  ;;  %v946_v49 = vld [vmem:[#allocation3 + $0x120] sm:$0xff] }
  0x16   :  { %514 = vmatpush.bf16.msra.mxu3 %v938_v16  ;;  %v954_v50 = vld [vmem:[#allocation3 + $0x160] sm:$0xff]  ;;  %v945_v51 = vld [vmem:[#allocation3 + $0x118] sm:$0xff]  ;;  %v57_v53 = vld.sshfl [vmem:[#allocation1 + $0x30] sm:$0xff pattern:$0x73625140] }
  0x17   :  { %476 = vmatpush.bf16.msra.mxu0 %v913_v17  ;;  %v953_v52 = vld [vmem:[#allocation3 + $0x158] sm:$0xff]  ;;  %v944_v54 = vld [vmem:[#allocation3 + $0x110] sm:$0xff]  ;;  %v71_v56 = vpack.c.bf16 %v57_v53, %v57_v53  ;;  %v943_v57 = vld [vmem:[#allocation3 + $0x108] sm:$0xff] }
  0x18   :  { %489 = vmatpush.bf16.msra.mxu1 %v921_v18  ;;  %v952_v55 = vld [vmem:[#allocation3 + $0x150] sm:$0xff]  ;;  %v951_v58 = vld [vmem:[#allocation3 + $0x148] sm:$0xff]  ;;  %v942_v59 = vld [vmem:[#allocation3 + $0x100] sm:$0xff] }
  0x19   :  { %502 = vmatpush.bf16.msra.mxu2 %v929_v20  ;;  %v950_v60 = vld [vmem:[#allocation3 + $0x140] sm:$0xff]  ;;  %v55_v61 = vld.sshfl [vmem:[#allocation1 + $0x20] sm:$0xff pattern:$0x73625140]  ;;  %v966_v1 = vld [vmem:[%s1120_s4 + $0x38] sm:$0xff] }
  0x1a   :  { %515 = vmatpush.bf16.msra.mxu3 %v937_v21  ;;  %v56_v62 = vld.sshfl [vmem:[#allocation1 + $0x28] sm:$0xff pattern:$0x73625140]  ;;  %v69_v63 = vpack.c.bf16 %v55_v61, %v55_v61  ;;  %v965_v2 = vld [vmem:[%s1120_s4 + $0x30] sm:$0xff]  ;;  %v963_v4 = vld [vmem:[%s1120_s4 + $0x20] sm:$0xff] }
  0x1b   :  { %477 = vmatpush.bf16.msra.mxu0 %v912_v22  ;;  %v70_v0 = vpack.c.bf16 %v56_v62, %v56_v62  ;;  %v964_v3 = vld [vmem:[%s1120_s4 + $0x28] sm:$0xff]  ;;  %v962_v5 = vld [vmem:[%s1120_s4 + $0x18] sm:$0xff]  ;;  %v961_v8 = vld [vmem:[%s1120_s4 + $0x10] sm:$0xff] }
  0x1c   :  { %490 = vmatpush.bf16.msra.mxu1 %v920_v23  ;;  %v960_v9 = vld [vmem:[%s1120_s4 + $0x8] sm:$0xff]  ;;  %v959_v10 = vld [vmem:[%s1120_s4] sm:$0xff]  ;;  %s43_s4 = smul.f32 0.5, %s1116_s0  ;;  %s1032_s0 = smov [#allocation6]  }
  0x1d   :  { %503 = vmatpush.bf16.msra.mxu2 %v928_v24  ;;  %v971_v15 = vld [vmem:[%s1119_s3] ss:$0 sm:$0xff] }
  0x1e   :  { %516 = vmatpush.bf16.msra.mxu3 %v936_v25  ;;  %v972_v37 = vld [vmem:[%s1121_s5] ss:$0 sm:$0xff]  ;;  %s669_s5 = sshll.u32 %s1032_s0, 4  ;;  %s670_s5 = int_to_ptr.vmem [resolvable:$true] %s669_s5 }
  0x1f   :  { %478 = vmatpush.bf16.msra.mxu0 %v911_v26 }
  0x20   :  { %491 = vmatpush.bf16.msra.mxu1 %v919_v27  ;;  %v563_v27 = vstv %s43_s4 }
  0x21   :  { %504 = vmatpush.bf16.msra.mxu2 %v927_v28 }
  0x22   :  { %517 = vmatpush.bf16.msra.mxu3 %v935_v31 }
  0x23   :  { %479 = vmatpush.bf16.msra.mxu0 %v910_v29 }
  0x24   :  { %492 = vmatpush.bf16.msra.mxu1 %v918_v30 }
  0x25   :  { %505 = vmatpush.bf16.msra.mxu2 %v926_v36 }
  0x26   :  { %480 = vmatmul.bf16.vlgmr.msra.gmra.mxu0 %v65_v38  ;;  %518 = vmatpush.bf16.msra.mxu3 %v934_v40 }
  0x27   :  { %524 = vmatpush.bf16.msrb.mxu0 %v949_v34  ;;  %493 = vmatmul.bf16.vlgmr.msra.gmra.mxu1 %v66_v39 }
  0x28   :  { %537 = vmatpush.bf16.msrb.mxu1 %v957_v35  ;;  %506 = vmatmul.bf16.vlgmr.msra.gmra.mxu2 %v67_v45 }
  0x29   :  { %557 = vmatpush.bf16.msrb.mxu2 %v958_v41  ;;  %519 = vmatmul.bf16.vlgmr.msra.gmra.mxu3 %v68_v46 }
  0x2a   :  { %637 = vmatpush.bf16.msrb.mxu3 %v966_v1 }
  0x2b   :  { %525 = vmatpush.bf16.msrb.mxu0 %v948_v43 }
  0x2c   :  { %538 = vmatpush.bf16.msrb.mxu1 %v956_v44 }
  0x2e   :  { %638 = vmatpush.bf16.msrb.mxu3 %v965_v2 }
  0x2f   :  { %526 = vmatpush.bf16.msrb.mxu0 %v947_v47 }
  0x30   :  { %539 = vmatpush.bf16.msrb.mxu1 %v955_v48 }
  0x32   :  { %639 = vmatpush.bf16.msrb.mxu3 %v964_v3 }
  0x33   :  { %527 = vmatpush.bf16.msrb.mxu0 %v946_v49 }
  0x34   :  { %540 = vmatpush.bf16.msrb.mxu1 %v954_v50 }
  0x36   :  { %640 = vmatpush.bf16.msrb.mxu3 %v963_v4 }
  0x37   :  { %528 = vmatpush.bf16.msrb.mxu0 %v945_v51 }
  0x38   :  { %541 = vmatpush.bf16.msrb.mxu1 %v953_v52  ;;  %877 = vmatmul.msk.bf16.vlgmr.msrb.gmra.mxu2 %vm468_vm0, %v71_v56 }
  0x3a   :  { %641 = vmatpush.bf16.msrb.mxu3 %v962_v5 }
  0x3b   :  { %529 = vmatpush.bf16.msrb.mxu0 %v944_v54 }
  0x3c   :  { %542 = vmatpush.bf16.msrb.mxu1 %v952_v55 }
  0x3e   :  { %642 = vmatpush.bf16.msrb.mxu3 %v961_v8 }
  0x3f   :  { %530 = vmatpush.bf16.msrb.mxu0 %v943_v57 }
  0x40   :  { %543 = vmatpush.bf16.msrb.mxu1 %v951_v58 }
  0x42   :  { %643 = vmatpush.bf16.msrb.mxu3 %v960_v9 }
  0x43   :  { %531 = vmatpush.bf16.msrb.mxu0 %v942_v59 }
  0x44   :  { %544 = vmatpush.bf16.msrb.mxu1 %v950_v60 }
  0x46   :  { %532 = vmatmul.bf16.vlgmr.msrb.gmra.mxu0 %v69_v63  ;;  %644 = vmatpush.bf16.msrb.mxu3 %v959_v10 }
  0x47   :  { %545 = vmatmul.bf16.vlgmr.msrb.gmra.mxu1 %v70_v0 }
  0xa3   :  { %v481_v6 = vpop.f32.mrf.mxu0 }
  0xa4   :  { %v494_v7 = vpop.f32.mrf.mxu1  ;;  %v482_v16 = vadd.f32 %v971_v15, %v481_v6 }
  0xa6   :  { %v495_v19 = vadd.f32 %v494_v7, %v482_v16 }
  0xab   :  { %v483_v11 = vpop.f32.mrf.mxu0  ;;  %v507_v13 = vpop.f32.mrf.mxu2 }
  0xac   :  { %v496_v12 = vpop.f32.mrf.mxu1  ;;  %v520_v14 = vpop.f32.mrf.mxu3  ;;  %v508_v20 = vadd.f32 %v507_v13, %v495_v19 }
  0xae   :  { %v521_v22 = vadd.f32 %v520_v14, %v508_v20 }
  0xb3   :  { %v509_v17 = vpop.f32.mrf.mxu2 }
  0xb4   :  { %v522_v18 = vpop.f32.mrf.mxu3 }
  0xbb   :  { %v559_v21 = vpop.f32.mrf.mxu2 }
  0xc3   :  { %v533_v23 = vpop.f32.mrf.mxu0  ;;  %v561_v28 = vpop.f32.mrf.mxu2 }
  0xc4   :  { %v546_v24 = vpop.f32.mrf.mxu1  ;;  %v534_v25 = vadd.f32 %v533_v23, %v521_v22 }
  0xc6   :  { %v547_v26 = vadd.f32 %v546_v24, %v534_v25 }
  0xc8   :  { %v560_v29 = vadd.f32 %v559_v21, %v547_v26 }
  0xca   :  { %v564_v30 = vmul.f32 %v563_v27, %v560_v29 }
  0xcb   :  { %v535_v31 = vpop.f32.mrf.mxu0 }
  0xcc   :  { %v548_v32 = vpop.f32.mrf.mxu1  ;;  %v565_v33 = vadd.f32 0.5, %v564_v30 }
  0xce   :  { %v566_v34 = vmax.f32 %v565_v33, 0.0 }
  0xd0   :  { %v567_v35 = vmin.f32 %v566_v34, 1.0 }
  0xd2   :  { %v568_v36 = vpack.c.bf16 %v567_v35, %v567_v35 }
  0xd4   :  { %645 = vmatmul.bf16.vlgmr.msrb.gmra.mxu3 %v568_v36 }
 0x157   :  { %v646_v38 = vpop.f32.mrf.mxu3 }
 0x158   :  { %v647_v39 = vadd.f32 %v972_v37, %v646_v38 }
 0x15a   :  { %v651_v40 = vsel %vm650_vm1, %v647_v39, -inf }
 0x15b   :  { %652 = vmax.xlane.f32.xlu0 %v651_v40 }
 0x15f   :  { %v648_v41 = vpop.f32.mrf.mxu3 }
 0x1ce   :  { %v653_v42 = vpop.xlane.xlu0 %652 }
 0x1cf   :  { %v654_v43 = vsub.f32 %v647_v39, %v653_v42 }
 0x1d1   :  { %v655_v44 = vmul.f32 1.442695, %v654_v43 }
 0x1d3   :  { %973 = vpow2.f32 %v655_v44 }
 0x1d9   :  { %v974_v45 = vpop.eup %973 }
 0x1da   :  { %v657_v46 = vsel %vm650_vm1, %v974_v45, 0.0 }
 0x1db   :  { %658 = vadd.xlane.f32.xlu0 %v657_v46 }
 0x24e   :  { %v659_v47 = vpop.xlane.xlu0 %658 }
 0x24f   :  { %975 = vlog2.f32 %v659_v47 }
 0x255   :  { %v976_v48 = vpop.eup %975 }
 0x256   :  { %v661_v49 = vmul.f32 0.6931472, %v976_v48 }
 0x258   :  { %v662_v50 = vsub.f32 %v654_v43, %v661_v49 }
 0x25a   :  { %663 = vst.msk [vmem:[#allocation6] sm:$0x3] %vm650_vm1, %v662_v50 }
 0x25b   :  { %674 = dma.vmem_to_hbm [thread:$0]  %s670_s5, 32, %s672_s28, [#allocation5]  }
 0x25c   :  { %1027 = dma.done.wait [#allocation5], 32  }
 0x25d   :  { %1028 = vsyncadd [#allocation5], 4294967264 }
 0x25e   :  { %679 = vsyncpa [#allocation4], 1 }
 0x25f   :  { %680 = vsyncpa [#allocation5], 1 }

</bundles_post_ra>
